<compile_context>
chip_gen: v7x
topology: tpu7x:2x2x1
jax: 0.10.0
libtpu: 0.0.40
codegen_flags: <defaults>
</compile_context>

<pallas_src>
import functools

import jax
import jax.numpy as jnp
from jax.experimental import pallas as pl
from jax.experimental.pallas import tpu as pltpu


def _round_up(n, m):
    return ((n + m - 1) // m) * m


def _default_matmul_dtype():
    """bf16 MXU operands on v6e/v7x, f32 elsewhere (v5e MXU handles f32 fine
    and bf16 elementwise lowers to extra converts there)."""
    try:
        kind = jax.devices()[0].device_kind.lower()
    except Exception:  # pragma: no cover - defensive
        return jnp.float32
    if ("v6" in kind) or ("v7" in kind):
        return jnp.bfloat16
    return jnp.float32


def _mlp_fused_kernel(x_ref, w_ref, b_ref, o_ref, *, n_layers):
    """x_ref: (B_pad, D_pad); w_ref: (L, D_pad, D_pad); b_ref: (L, 1, D_pad).

    Computes x <- tanh(x @ W_i + b_i) for every layer, entirely in vregs.
    Padded lanes/rows are zero and stay zero (tanh(0) == 0).
    """
    x = x_ref[...]                      # f32 activations
    for i in range(n_layers):           # statically unrolled
        w = w_ref[i]                     # (D_pad, D_pad), possibly bf16
        xin = x if x.dtype == w.dtype else x.astype(w.dtype)
        acc = jnp.dot(xin, w, preferred_element_type=jnp.float32)  # f32 accum
        # Bias-add + tanh in f32 (single EUP-wide vreg per 8 sublanes since
        # D_pad is a multiple of 128 — no masked lanes, no wasted EUP beyond
        # the vreg granularity).
        x = jnp.tanh(acc + b_ref[i])
    o_ref[...] = x.astype(o_ref.dtype)


def mlp_forward_pallas(x, w_stack, b_stack, *, out_dim):
    """Fused MLP forward.

    x:       (B, input_size) f32
    w_stack: (L, D_pad, D_pad)   zero-padded, weights already (in, out) layout
    b_stack: (L, 1, D_pad) f32   zero-padded biases
    out_dim: true output width of the last layer (static)
    """
    B, din = x.shape
    n_layers, _, d_pad = w_stack.shape

    b_pad = _round_up(max(B, 8), 8)
    x_pad = jnp.pad(x, ((0, b_pad - B), (0, d_pad - din)))

    # Advisory cost estimate (padded shapes).
    flops = 2 * b_pad * d_pad * d_pad * n_layers
    transcendentals = b_pad * d_pad * n_layers
    bytes_accessed = (
        x_pad.size * x_pad.dtype.itemsize
        + w_stack.size * w_stack.dtype.itemsize
        + b_stack.size * b_stack.dtype.itemsize
        + b_pad * d_pad * x.dtype.itemsize
    )

    vmem_spec = pl.BlockSpec(memory_space=pltpu.MemorySpace.VMEM)
    out_pad = pl.pallas_call(
        functools.partial(_mlp_fused_kernel, n_layers=n_layers),
        out_shape=jax.ShapeDtypeStruct((b_pad, d_pad), x.dtype),
        in_specs=[vmem_spec, vmem_spec, vmem_spec],
        out_specs=vmem_spec,
        cost_estimate=pl.CostEstimate(
            flops=flops,
            transcendentals=transcendentals,
            bytes_accessed=bytes_accessed,
        ),
    )(x_pad, w_stack, b_stack)

    # Lane-dense (128-wide) store inside the kernel; slice to true shape here.
    return out_pad[:B, :out_dim]


def init_params(key, input_size, layers_specs, dtype=jnp.float32):
    """Deterministic init matching nn.Linear shapes (stored pre-transposed)."""
    params = []
    current_dim = input_size
    for h in layers_specs:
        key, kw, kb = jax.random.split(key, 3)
        bound = 1.0 / jnp.sqrt(current_dim)
        # torch stores weight as (out, in); we keep the transposed (in, out)
        # so the kernel computes x @ W + b == torch's x @ W.T + b.
        w = jax.random.uniform(kw, (current_dim, h), dtype, -bound, bound)
        b = jax.random.uniform(kb, (h,), dtype, -bound, bound)
        params.append((w, b))
        current_dim = h
    return params


def pack_params(params, input_size, weight_dtype=jnp.float32):
    """Zero-pad all layers to a common 128-multiple width and stack them."""
    dims = [input_size] + [int(b.shape[0]) for _, b in params]
    d_pad = _round_up(max(dims), 128)
    n_layers = len(params)
    w_stack = jnp.zeros((n_layers, d_pad, d_pad), weight_dtype)
    b_stack = jnp.zeros((n_layers, 1, d_pad), jnp.float32)
    for i, (w, b) in enumerate(params):
        din, dout = w.shape
        w_stack = w_stack.at[i, :din, :dout].set(w.astype(weight_dtype))
        b_stack = b_stack.at[i, 0, :dout].set(b.astype(jnp.float32))
    return w_stack, b_stack, dims


@functools.partial(jax.jit, static_argnames=("out_dim",))
def net_forward(x, w_stack, b_stack, out_dim):
    return mlp_forward_pallas(x, w_stack, b_stack, out_dim=out_dim)


def net_forward_ref(x, params):
    for w, b in params:
        x = jnp.tanh(x @ w + b)
    return x


if __name__ == "__main__":
    key = jax.random.PRNGKey(0)
    batch = 8            # NOTE: callers should batch many samples per call to
    input_size = 32      # amortize dispatch overhead; per-call cost is ~flat.
    layers_specs = [64, 32, 16]

    kx, kp = jax.random.split(key)
    x = jax.random.normal(kx, (batch, input_size), jnp.float32)
    params = init_params(kp, input_size, layers_specs)

    matmul_dtype = _default_matmul_dtype()
    w_stack, b_stack, _ = pack_params(params, input_size, weight_dtype=matmul_dtype)

    out = net_forward(x, w_stack, b_stack, out_dim=layers_specs[-1])
    out = jax.block_until_ready(out)

    ref = net_forward_ref(x, params)
    assert out.shape == (batch, layers_specs[-1])
    # bf16 MXU operands on v6e/v7x need a looser tolerance than pure-f32.
    if matmul_dtype == jnp.float32:
        atol = rtol = 1e-5
    else:
        atol = rtol = 3e-2
    assert jnp.allclose(out, ref, atol=atol, rtol=rtol)

    print("KERNEL_OK")
</pallas_src>

<mosaic_0001>
module attributes {stable_mosaic.version = 11 : i64} {
  func.func @_mlp_fused_kernel(%arg0: memref<8x128xf32, #tpu.memory_space<vmem>>, %arg1: memref<3x128x128xf32, #tpu.memory_space<vmem>>, %arg2: memref<3x1x128xf32, #tpu.memory_space<vmem>>, %arg3: memref<8x128xf32, #tpu.memory_space<vmem>>) attributes {dimension_semantics = [], scalar_prefetch = 0 : i64, scratch_operands = 0 : i64, tpu.core_type = #tpu.core_type<tc>} {
    %c0 = arith.constant 0 : index
    %c0_0 = arith.constant 0 : index
    %0 = vector.load %arg0[%c0, %c0_0] : memref<8x128xf32, #tpu.memory_space<vmem>>, vector<8x128xf32>
    %c0_1 = arith.constant 0 : index
    %c0_2 = arith.constant 0 : index
    %c0_3 = arith.constant 0 : index
    %1 = vector.load %arg1[%c0_1, %c0_2, %c0_3] : memref<3x128x128xf32, #tpu.memory_space<vmem>>, vector<1x128x128xf32>
    %2 = vector.shape_cast %1 : vector<1x128x128xf32> to vector<128x128xf32>
    %cst = arith.constant dense<0.000000e+00> : vector<8x128xf32>
    %3 = tpu.matmul %0, %2, %cst {dimension_numbers = #tpu.dot_dimension_numbers<[1], [0], [0], [1], [0, 0, 1, 1], [], []>} : vector<8x128xf32>, vector<128x128xf32>, vector<8x128xf32> -> vector<8x128xf32>
    %c0_4 = arith.constant 0 : index
    %c0_5 = arith.constant 0 : index
    %c0_6 = arith.constant 0 : index
    %4 = vector.load %arg2[%c0_4, %c0_5, %c0_6] : memref<3x1x128xf32, #tpu.memory_space<vmem>>, vector<1x1x128xf32>
    %5 = vector.shape_cast %4 : vector<1x1x128xf32> to vector<1x128xf32>
    %6 = vector.broadcast %5 : vector<1x128xf32> to vector<8x128xf32>
    %7 = arith.addf %3, %6 : vector<8x128xf32>
    %8 = math.tanh %7 : vector<8x128xf32>
    %c1 = arith.constant 1 : index
    %c0_7 = arith.constant 0 : index
    %c0_8 = arith.constant 0 : index
    %9 = vector.load %arg1[%c1, %c0_7, %c0_8] : memref<3x128x128xf32, #tpu.memory_space<vmem>>, vector<1x128x128xf32>
    %10 = vector.shape_cast %9 : vector<1x128x128xf32> to vector<128x128xf32>
    %cst_9 = arith.constant dense<0.000000e+00> : vector<8x128xf32>
    %11 = tpu.matmul %8, %10, %cst_9 {dimension_numbers = #tpu.dot_dimension_numbers<[1], [0], [0], [1], [0, 0, 1, 1], [], []>} : vector<8x128xf32>, vector<128x128xf32>, vector<8x128xf32> -> vector<8x128xf32>
    %c1_10 = arith.constant 1 : index
    %c0_11 = arith.constant 0 : index
    %c0_12 = arith.constant 0 : index
    %12 = vector.load %arg2[%c1_10, %c0_11, %c0_12] : memref<3x1x128xf32, #tpu.memory_space<vmem>>, vector<1x1x128xf32>
    %13 = vector.shape_cast %12 : vector<1x1x128xf32> to vector<1x128xf32>
    %14 = vector.broadcast %13 : vector<1x128xf32> to vector<8x128xf32>
    %15 = arith.addf %11, %14 : vector<8x128xf32>
    %16 = math.tanh %15 : vector<8x128xf32>
    %c2 = arith.constant 2 : index
    %c0_13 = arith.constant 0 : index
    %c0_14 = arith.constant 0 : index
    %17 = vector.load %arg1[%c2, %c0_13, %c0_14] : memref<3x128x128xf32, #tpu.memory_space<vmem>>, vector<1x128x128xf32>
    %18 = vector.shape_cast %17 : vector<1x128x128xf32> to vector<128x128xf32>
    %cst_15 = arith.constant dense<0.000000e+00> : vector<8x128xf32>
    %19 = tpu.matmul %16, %18, %cst_15 {dimension_numbers = #tpu.dot_dimension_numbers<[1], [0], [0], [1], [0, 0, 1, 1], [], []>} : vector<8x128xf32>, vector<128x128xf32>, vector<8x128xf32> -> vector<8x128xf32>
    %c2_16 = arith.constant 2 : index
    %c0_17 = arith.constant 0 : index
    %c0_18 = arith.constant 0 : index
    %20 = vector.load %arg2[%c2_16, %c0_17, %c0_18] : memref<3x1x128xf32, #tpu.memory_space<vmem>>, vector<1x1x128xf32>
    %21 = vector.shape_cast %20 : vector<1x1x128xf32> to vector<1x128xf32>
    %22 = vector.broadcast %21 : vector<1x128xf32> to vector<8x128xf32>
    %23 = arith.addf %19, %22 : vector<8x128xf32>
    %24 = math.tanh %23 : vector<8x128xf32>
    %c0_19 = arith.constant 0 : index
    %c0_20 = arith.constant 0 : index
    %25 = vector.load %arg3[%c0_19, %c0_20] : memref<8x128xf32, #tpu.memory_space<vmem>>, vector<8x128xf32>
    tpu.vector_store %arg3[%c0_19, %c0_20], %24 {strides = array<i32>} : memref<8x128xf32, #tpu.memory_space<vmem>>, vector<8x128xf32>,
    return
  }
}

</mosaic_0001>

<bundles_post_ra>
// kernel: net_forward.1
= control target key start
LH: loop header
LB: loop body
LE: loop exit
PB: predicated region body
PF: predicated region fallthrough
CT: control target
= control target key end

     0   :  { %8 = vsyncpa [#allocation3], 0  ;;  %s719_s0 = inlined_call_operand.vmem [shape: f32[8,128], index: 0, kind: input, shape index: {}]   ;;  %s720_s1 = inlined_call_operand.hbm [shape: f32[3,128,128], index: 1, kind: input, shape index: {}]   ;;  %s721_s2 = inlined_call_operand.vmem [shape: f32[3,1,128], index: 2, kind: input, shape index: {}]   ;;  %s722_s3 = inlined_call_operand.hbm [shape: f32[8,128], index: 3, kind: output, shape index: {}]  }
   0x1   :  { %9 = vsyncpa [#allocation4], 0  ;;  %s626_s12 = smov [#allocation2]   ;;  %s578_s16 = scalar_lea.hbm %s720_s1, 6144 }
   0x2   :  { %s17_s13 = sshll.u32 %s626_s12, 4  ;;  %p579_p0 = scmp.ne.s32.totalorder %s720_s1, %s578_s16  ;;  %s18_s13 = int_to_ptr.vmem [resolvable:$true] %s17_s13 }
   0x3   :  { %p582_p1 = scmp.lt.u32.totalorder %s578_s16, %s720_s1 }
   0x5   :  { %p584_p2 = pnand %p582_p1, %p579_p0 }
   0x7   :  { %587 = shalt.err (!%p584_p2)
}
   0x8   :  { %s588_s21 = scalar_lea.vmem %s18_s13, 6144  ;;  %p593_p4 = scmp.lt.s32.totalorder %s18_s13, %s18_s13 }
   0x9   :  { %p589_p3 = scmp.ne.s32.totalorder %s18_s13, %s588_s21  ;;  %p594_p5 = scmp.lt.s32.totalorder %s588_s21, %s588_s21 }
   0xb   :  { %p595_p6 = por %p594_p5, %p593_p4 }
   0xd   :  { %p596_p7 = pnand %p595_p6, %p589_p3 }
   0xf   :  { %599 = shalt.err (!%p596_p7)
}
  0x10   :  { %s627_s22 = smov 128   ;;  %s628_s23 = smov 8  }
  0x11   :  { %23 = dma.hbm_to_vmem [thread:$0]  %s720_s1, 6144, %s18_s13, [#allocation3], %s627_s22, %s627_s22, %s628_s23  }
  0x12   :  { %622 = dma.done.wait [#allocation3], 6144  }
  0x13   :  { %623 = vsyncadd [#allocation3], 4294961152  ;;  %v629_v0 = vmov 0.0|0.0   ;;  %vm630_vm0 = vmmov 0   ;;  %v631_v1 = vmov 0.0   ;;  %v30_v2 = vld [vmem:[#allocation2] sm:$0xff] }
  0x14   :  { %493 = vmatprep.subr.bf16.mxu0 %v629_v0  ;;  %420 = vmatprep.mubr.msk.f32.mxu0 %vm630_vm0, %v631_v1  ;;  %v31_v3 = vld [vmem:[#allocation2 + $0x8] sm:$0xff]  ;;  %v32_v4 = vld [vmem:[#allocation2 + $0x10] sm:$0xff]  ;;  %v33_v6 = vld [vmem:[#allocation2 + $0x18] sm:$0xff]  ;;  %s632_s5 = smov [#allocation5]  }
  0x15   :  { %517 = vmatprep.subr.bf16.mxu1 %v629_v0  ;;  %455 = vmatprep.mubr.msk.f32.mxu1 %vm630_vm0, %v631_v1  ;;  %v494_v5 = vpack.c.bf16 %v31_v3, %v30_v2  ;;  %v497_v7 = vpack.c.bf16 %v33_v6, %v32_v4  ;;  %v34_v8 = vld [vmem:[#allocation2 + $0x20] sm:$0xff]  ;;  %v35_v9 = vld [vmem:[#allocation2 + $0x28] sm:$0xff]  ;;  %v127_v12 = vld [vmem:[#allocation2 + $0x90] sm:$0xff]  ;;  %s323_s6 = sshll.u32 %s632_s5, 4  ;;  %s324_s6 = int_to_ptr.vmem [resolvable:$true] %s323_s6 }
  0x16   :  { %v125_v10 = vld [vmem:[#allocation2 + $0x80] sm:$0xff]  ;;  %v126_v11 = vld [vmem:[#allocation2 + $0x88] sm:$0xff]  ;;  %v128_v13 = vld [vmem:[#allocation2 + $0x98] sm:$0xff]  ;;  %v500_v14 = vpack.c.bf16 %v35_v9, %v34_v8  ;;  %s600_s7 = scalar_lea.vmem %s324_s6, 128  ;;  %p605_p9 = scmp.lt.s32.totalorder %s324_s6, %s324_s6 }
  0x17   :  { %495 = vmatpush3.bf16.msra.mxu0 %v494_v5  ;;  %v518_v15 = vpack.c.bf16 %v126_v11, %v125_v10  ;;  %v36_v16 = vld [vmem:[#allocation2 + $0x30] sm:$0xff]  ;;  %v37_v17 = vld [vmem:[#allocation2 + $0x38] sm:$0xff]  ;;  %v521_v18 = vpack.c.bf16 %v128_v13, %v127_v12  ;;  %v129_v19 = vld [vmem:[#allocation2 + $0xa0] sm:$0xff]  ;;  %p601_p8 = scmp.ne.s32.totalorder %s324_s6, %s600_s7  ;;  %p606_p10 = scmp.lt.s32.totalorder %s600_s7, %s600_s7 }
  0x18   :  { %496 = vmatprep.subr.bf16.mxu0 %v629_v0  ;;  %v130_v20 = vld [vmem:[#allocation2 + $0xa8] sm:$0xff]  ;;  %v503_v21 = vpack.c.bf16 %v37_v17, %v36_v16  ;;  %v38_v22 = vld [vmem:[#allocation2 + $0x40] sm:$0xff]  ;;  %v131_v25 = vld [vmem:[#allocation2 + $0xb0] sm:$0xff] }
  0x19   :  { %519 = vmatpush3.bf16.msra.mxu1 %v518_v15  ;;  %v39_v23 = vld [vmem:[#allocation2 + $0x48] sm:$0xff]  ;;  %v524_v24 = vpack.c.bf16 %v130_v20, %v129_v19  ;;  %v132_v26 = vld [vmem:[#allocation2 + $0xb8] sm:$0xff]  ;;  %v40_v28 = vld [vmem:[#allocation2 + $0x50] sm:$0xff]  ;;  %p607_p11 = por %p606_p10, %p605_p9 }
  0x1a   :  { %520 = vmatprep.subr.bf16.mxu1 %v629_v0  ;;  %v506_v27 = vpack.c.bf16 %v39_v23, %v38_v22  ;;  %v41_v29 = vld [vmem:[#allocation2 + $0x58] sm:$0xff]  ;;  %v527_v30 = vpack.c.bf16 %v132_v26, %v131_v25  ;;  %v133_v31 = vld [vmem:[#allocation2 + $0xc0] sm:$0xff]  ;;  %v134_v32 = vld [vmem:[#allocation2 + $0xc8] sm:$0xff] }
  0x1b   :  { %498 = vmatpush3.bf16.msra.mxu0 %v497_v7  ;;  %v509_v33 = vpack.c.bf16 %v41_v29, %v40_v28  ;;  %v42_v34 = vld [vmem:[#allocation2 + $0x60] sm:$0xff]  ;;  %v43_v35 = vld [vmem:[#allocation2 + $0x68] sm:$0xff]  ;;  %v530_v36 = vpack.c.bf16 %v134_v32, %v133_v31  ;;  %v44_v38 = vld [vmem:[#allocation2 + $0x70] sm:$0xff]  ;;  %p608_p12 = pnand %p607_p11, %p601_p8 }
  0x1c   :  { %499 = vmatprep.subr.bf16.mxu0 %v629_v0  ;;  %v512_v37 = vpack.c.bf16 %v43_v35, %v42_v34  ;;  %v45_v39 = vld [vmem:[#allocation2 + $0x78] sm:$0xff]  ;;  %v135_v42 = vld [vmem:[#allocation2 + $0xd0] sm:$0xff]  ;;  %v137_v45 = vld [vmem:[#allocation2 + $0xe0] sm:$0xff] }
  0x1d   :  { %522 = vmatpush3.bf16.msra.mxu1 %v521_v18  ;;  %v515_v40 = vpack.c.bf16 %v45_v39, %v44_v38  ;;  %v29_v41 = vld [vmem:[%s719_s0] sm:$0xff]  ;;  %v138_v46 = vld [vmem:[#allocation2 + $0xe8] sm:$0xff]  ;;  %v139_v48 = vld [vmem:[#allocation2 + $0xf0] sm:$0xff] }
  0x1e   :  { %523 = vmatprep.subr.bf16.mxu1 %v629_v0  ;;  %v136_v43 = vld [vmem:[#allocation2 + $0xd8] sm:$0xff]  ;;  %v536_v47 = vpack.c.bf16 %v138_v46, %v137_v45  ;;  %v221_v51 = vld [vmem:[#allocation2 + $0x100] sm:$0xff]  ;;  %v222_v52 = vld [vmem:[#allocation2 + $0x108] sm:$0xff] }
  0x1f   :  { %501 = vmatpush3.bf16.msra.mxu0 %v500_v14  ;;  %v533_v44 = vpack.c.bf16 %v136_v43, %v135_v42  ;;  %v140_v49 = vld [vmem:[#allocation2 + $0xf8] sm:$0xff]  ;;  %v223_v53 = vld [vmem:[#allocation2 + $0x110] sm:$0xff]  ;;  %v542_v54 = vpack.c.bf16 %v222_v52, %v221_v51  ;;  %v225_v57 = vld [vmem:[#allocation2 + $0x120] sm:$0xff] }
  0x20   :  { %502 = vmatprep.subr.bf16.mxu0 %v629_v0  ;;  %v539_v50 = vpack.c.bf16 %v140_v49, %v139_v48  ;;  %v224_v55 = vld [vmem:[#allocation2 + $0x118] sm:$0xff]  ;;  %v226_v58 = vld [vmem:[#allocation2 + $0x128] sm:$0xff]  ;;  %v227_v60 = vld [vmem:[#allocation2 + $0x130] sm:$0xff] }
  0x21   :  { %525 = vmatpush3.bf16.msra.mxu1 %v524_v24  ;;  %v545_v56 = vpack.c.bf16 %v224_v55, %v223_v53  ;;  %v548_v59 = vpack.c.bf16 %v226_v58, %v225_v57  ;;  %v228_v61 = vld [vmem:[#allocation2 + $0x138] sm:$0xff]  ;;  %v229_v63 = vld [vmem:[#allocation2 + $0x140] sm:$0xff]  ;;  %v231_v8 = vld [vmem:[#allocation2 + $0x150] sm:$0xff] }
  0x22   :  { %526 = vmatprep.subr.bf16.mxu1 %v629_v0  ;;  %v551_v62 = vpack.c.bf16 %v228_v61, %v227_v60  ;;  %v332_v3 = vld [vmem:[%s721_s2] ss:$0 sm:$0xff]  ;;  %v233_v11 = vld [vmem:[#allocation2 + $0x160] sm:$0xff]  ;;  %v234_v12 = vld [vmem:[#allocation2 + $0x168] sm:$0xff] }
  0x23   :  { %504 = vmatpush3.bf16.msra.mxu0 %v503_v21  ;;  %v232_v9 = vld [vmem:[#allocation2 + $0x158] sm:$0xff]  ;;  %v560_v13 = vpack.c.bf16 %v234_v12, %v233_v11  ;;  %v235_v14 = vld [vmem:[#allocation2 + $0x170] sm:$0xff] }
  0x24   :  { %505 = vmatprep.subr.bf16.mxu0 %v629_v0  ;;  %v557_v10 = vpack.c.bf16 %v232_v9, %v231_v8  ;;  %v236_v15 = vld [vmem:[#allocation2 + $0x178] sm:$0xff] }
  0x25   :  { %528 = vmatpush3.bf16.msra.mxu1 %v527_v30  ;;  %v563_v16 = vpack.c.bf16 %v236_v15, %v235_v14  ;;  %v334_v17 = vld [vmem:[%s721_s2 + $0x1] ss:$0 sm:$0xff]  ;;  %v336_v22 = vld [vmem:[%s721_s2 + $0x2] ss:$0 sm:$0xff] }
  0x26   :  { %529 = vmatprep.subr.bf16.mxu1 %v629_v0 }
  0x27   :  { %507 = vmatpush3.bf16.msra.mxu0 %v506_v27 }
  0x28   :  { %508 = vmatprep.subr.bf16.mxu0 %v629_v0 }
  0x29   :  { %531 = vmatpush3.bf16.msra.mxu1 %v530_v36 }
  0x2a   :  { %532 = vmatprep.subr.bf16.mxu1 %v629_v0 }
  0x2b   :  { %510 = vmatpush3.bf16.msra.mxu0 %v509_v33 }
  0x2c   :  { %511 = vmatprep.subr.bf16.mxu0 %v629_v0 }
  0x2d   :  { %534 = vmatpush3.bf16.msra.mxu1 %v533_v44 }
  0x2e   :  { %535 = vmatprep.subr.bf16.mxu1 %v629_v0 }
  0x2f   :  { %513 = vmatpush3.bf16.msra.mxu0 %v512_v37 }
  0x30   :  { %514 = vmatprep.subr.bf16.mxu0 %v629_v0 }
  0x31   :  { %537 = vmatpush3.bf16.msra.mxu1 %v536_v47 }
  0x32   :  { %538 = vmatprep.subr.bf16.mxu1 %v629_v0 }
  0x33   :  { %516 = vmatpush3.bf16.msra.mxu0 %v515_v40 }
  0x34   :  { %541 = vmatprep.subr.bf16.mxu0 %v629_v0 }
  0x35   :  { %540 = vmatpush3.bf16.msra.mxu1 %v539_v50 }
  0x36   :  { %421 = vmatmul.mubr.f32.vlgmr.msra.gmra.mrb[0].mxu0 %v29_v41 }
  0x37   :  { %490 = vmatprep.mubr.msk.f32.mxu0 %vm630_vm0, %v631_v1  ;;  %543 = vmatpush3.bf16.msra.mxu0 %v542_v54  ;;  %v230_v1 = vld [vmem:[#allocation2 + $0x148] sm:$0xff] }
  0x38   :  { %544 = vmatprep.subr.bf16.mxu0 %v629_v0  ;;  %v554_v2 = vpack.c.bf16 %v230_v1, %v229_v63 }
  0x3b   :  { %546 = vmatpush3.bf16.msra.mxu0 %v545_v56 }
  0x3c   :  { %547 = vmatprep.subr.bf16.mxu0 %v629_v0 }
  0x3f   :  { %549 = vmatpush3.bf16.msra.mxu0 %v548_v59 }
  0x40   :  { %550 = vmatprep.subr.bf16.mxu0 %v629_v0 }
  0x43   :  { %552 = vmatpush3.bf16.msra.mxu0 %v551_v62 }
  0x44   :  { %553 = vmatprep.subr.bf16.mxu0 %v629_v0 }
  0x47   :  { %555 = vmatpush3.bf16.msra.mxu0 %v554_v2 }
  0x48   :  { %556 = vmatprep.subr.bf16.mxu0 %v629_v0 }
  0x4b   :  { %558 = vmatpush3.bf16.msra.mxu0 %v557_v10 }
  0x4c   :  { %559 = vmatprep.subr.bf16.mxu0 %v629_v0 }
  0x4f   :  { %561 = vmatpush3.bf16.msra.mxu0 %v560_v13 }
  0x50   :  { %562 = vmatprep.subr.bf16.mxu0 %v629_v0 }
  0x53   :  { %564 = vmatpush3.bf16.msra.mxu0 %v563_v16 }
 0x109   :  { %v119_v4 = vpop.f32.mrb[0].mxu0 }
 0x10a   :  { %v120_v5 = vadd.f32 %v332_v3, %v119_v4  ;;  %v422_v6 = vpop.f32.mrb[1].mxu0 }
 0x10c   :  { %572 = vtanh.f32 %v120_v5 }
 0x116   :  { %v573_v7 = vpop.eup %572 }
 0x117   :  { %456 = vmatmul.mubr.f32.vlgmr.msra.gmra.mrb[0].mxu1 %v573_v7 }
 0x1ea   :  { %v215_v18 = vpop.f32.mrb[0].mxu1 }
 0x1eb   :  { %v216_v19 = vadd.f32 %v334_v17, %v215_v18  ;;  %v457_v20 = vpop.f32.mrb[1].mxu1 }
 0x1ed   :  { %574 = vtanh.f32 %v216_v19 }
 0x1f7   :  { %v575_v21 = vpop.eup %574 }
 0x1f8   :  { %491 = vmatmul.mubr.f32.vlgmr.msra.gmra.mrb[2].mxu0 %v575_v21 }
 0x2cb   :  { %v311_v23 = vpop.f32.mrb[2].mxu0 }
 0x2cc   :  { %v312_v24 = vadd.f32 %v336_v22, %v311_v23  ;;  %v492_v25 = vpop.f32.mrb[3].mxu0 }
 0x2ce   :  { %576 = vtanh.f32 %v312_v24 }
 0x2d8   :  { %v577_v0 = vpop.eup %576 }
 0x2d9   :  { %316 = vst [vmem:[#allocation5] sm:$0xff] %v577_v0 }
 0x2da   :  { %611 = shalt.err (!%p608_p12)
}
 0x2db   :  { %s612_s2 = scalar_lea.hbm %s722_s3, 128 }
 0x2dc   :  { %p613_p13 = scmp.ne.s32.totalorder %s722_s3, %s612_s2  ;;  %p616_p0 = scmp.lt.u32.totalorder %s612_s2, %s722_s3 }
 0x2de   :  { %p618_p1 = pnand %p616_p0, %p613_p13 }
 0x2e0   :  { %621 = shalt.err (!%p618_p1)
}
 0x2e1   :  { %326 = dma.vmem_to_hbm [thread:$0]  %s324_s6, 128, %s722_s3, [#allocation4]  }
 0x2e2   :  { %624 = dma.done.wait [#allocation4], 128  }
 0x2e3   :  { %625 = vsyncadd [#allocation4], 4294967168 }
 0x2e4   :  { %330 = vsyncpa [#allocation3], 1 }
 0x2e5   :  { %331 = vsyncpa [#allocation4], 1 }

</bundles_post_ra>
